<compile_context>
chip_gen: v5e
topology: v5e:2x2
jax: 0.10.0
libtpu: 0.0.40
codegen_flags: <defaults>
</compile_context>

<pallas_src>
import functools

import jax
import jax.numpy as jnp
from jax import lax
from jax.experimental import pallas as pl
from jax.experimental.pallas import tpu as pltpu


# ---------------------------------------------------------------------------
# Tiling heuristics.
# ---------------------------------------------------------------------------
def _pick_block_s(seq_len: int, cap: int = 512) -> int:
    """Seq-tile rows: full S when small, else largest multiple-of-8 divisor <= cap,
    else `cap` (the ragged last block is handled by Pallas boundary masking)."""
    if seq_len <= cap:
        return seq_len
    for cand in range(cap, 7, -8):
        if seq_len % cand == 0:
            return cand
    return cap


def _pick_block_b(batch: int, block_s: int, d: int, itemsize: int,
                  budget_bytes: int = 12 * 1024 * 1024, cap: int = 8) -> int:
    """Batch rows per grid step, capped so double-buffered in+out blocks stay well
    under the conservative 16 MiB scoped-VMEM default (v5e) / 64 MiB physical (v7x)."""
    per_row = 4 * block_s * d * itemsize            # in + out, double buffered
    return int(max(1, min(batch, cap, budget_bytes // max(per_row, 1))))


# ---------------------------------------------------------------------------
# Kernel body (shared by masked / unmasked variants).
#   offset_ref : SMEM f32[H]              per-head learnable offset
#   pos_ref    : VMEM f32[block_s, 1]     timestep index of each row (s // num_nodes)
#   freq_ref   : VMEM f32[1, D]           parity-signed inverse frequencies
#   x_ref/o_ref: VMEM [block_b, 1, block_s, D]
#   mask_ref   : VMEM i32[block_b, block_s, 1] or None
#   cos_ref/ss_ref : VMEM f32[block_s, D] trig cache (persists across the batch axis)
# ---------------------------------------------------------------------------
def _rope_body(offset_ref, pos_ref, freq_ref, x_ref, mask_ref, o_ref, cos_ref, ss_ref,
               *, block_b, gate_on_batch):
    # program_id values are taken at the top level only; the pl.when body just closes
    # over them (never calls pl.program_id itself).
    head = pl.program_id(0)

    def refill():
        # angle[s, j] = sign_j * (t_s + offset_h) * base**(-2*(j//2)/D).
        # cos is even so cos_ref is the plain cos; sin is odd so ss_ref already carries
        # the interleaved (-sin, +sin) pattern — no extra masking needed.
        angle = (pos_ref[...] + offset_ref[head]) * freq_ref[...]
        cos_ref[...] = jnp.cos(angle)
        ss_ref[...] = jnp.sin(angle)

    if gate_on_batch:
        batch_blk = pl.program_id(2)
        pl.when(batch_blk == 0)(refill)      # refill once per (head, seq-tile)
    else:
        refill()                             # whole batch in one step: fill every step

    d = cos_ref.shape[-1]
    lane = lax.broadcasted_iota(jnp.int32, (1, d), 1)
    even_lane = (lane % 2) == 0              # compile-time-constant parity vreg

    cos = cos_ref[...]
    ss = ss_ref[...]
    for i in range(block_b):                 # static unroll over the batch block
        xb = x_ref[i, 0].astype(jnp.float32)              # [block_s, D], interleaved pairs
        # Pair swap on the XLU (np.roll convention: out[j] = in[j - shift]).
        x_next = pltpu.roll(xb, shift=d - 1, axis=1)      # out[:, j] = x[:, j+1 (mod d)]
        x_prev = pltpu.roll(xb, shift=1, axis=1)          # out[:, j] = x[:, j-1 (mod d)]
        swapped = jnp.where(even_lane, x_next, x_prev)    # wrap lanes are never selected
        rot = xb * cos + swapped * ss
        if mask_ref is not None:
            keep = mask_ref[i] != 0                       # [block_s, 1] -> broadcast lanes
            rot = jnp.where(keep, rot, xb)                # masked rows pass through
        o_ref[i, 0] = rot.astype(o_ref.dtype)


def _rope_kernel(offset_ref, pos_ref, freq_ref, x_ref, o_ref, cos_ref, ss_ref,
                 *, block_b, gate_on_batch):
    _rope_body(offset_ref, pos_ref, freq_ref, x_ref, None, o_ref, cos_ref, ss_ref,
               block_b=block_b, gate_on_batch=gate_on_batch)


def _rope_kernel_masked(offset_ref, pos_ref, freq_ref, x_ref, mask_ref, o_ref,
                        cos_ref, ss_ref, *, block_b, gate_on_batch):
    _rope_body(offset_ref, pos_ref, freq_ref, x_ref, mask_ref, o_ref, cos_ref, ss_ref,
               block_b=block_b, gate_on_batch=gate_on_batch)


# ---------------------------------------------------------------------------
# Wrapper.
# ---------------------------------------------------------------------------
def temporal_rope_with_offset(x, offset, mask, *, num_timesteps, base=1000.0,
                              block_s=None, block_b=None):
    """x: [B, H, S, D] with S = num_nodes * num_timesteps; offset: [H];
    mask: [B, S, 1] (bool/num) or None.  Returns [B, H, S, D]."""
    B, H, S, D = x.shape
    assert D % 2 == 0, "d_head must be even"
    assert S % num_timesteps == 0, "seq_len must be divisible by num_timesteps"
    num_nodes = S // num_timesteps

    if block_s is None:
        block_s = _pick_block_s(S)
    n_s = pl.cdiv(S, block_s)
    if block_b is None:
        block_b = _pick_block_b(B, block_s, D, x.dtype.itemsize)
    n_b = pl.cdiv(B, block_b)

    # Tiny host-side precomputes (mirror the module's `freqs` buffer):
    #   pos[s]        = s // num_nodes                      (timestep of each row)
    #   freq_signed[j]= (-1 if j even else +1) * base**(-2*(j//2)/D)
    pos = (jnp.arange(S, dtype=jnp.int32) // num_nodes).astype(jnp.float32).reshape(S, 1)
    idx = jnp.arange(D, dtype=jnp.int32)
    inv_freq = jnp.float32(base) ** (-2.0 * (idx // 2).astype(jnp.float32) / D)
    sign = jnp.where(idx % 2 == 0, -1.0, 1.0)
    freq_signed = (sign * inv_freq).astype(jnp.float32).reshape(1, D)

    offset_spec = pl.BlockSpec(memory_space=pltpu.MemorySpace.SMEM)   # whole [H] in SMEM
    pos_spec = pl.BlockSpec((block_s, 1), lambda h, si, b: (si, 0))
    freq_spec = pl.BlockSpec((1, D), lambda h, si, b: (0, 0))
    x_spec = pl.BlockSpec((block_b, 1, block_s, D), lambda h, si, b: (b, h, si, 0))
    o_spec = pl.BlockSpec((block_b, 1, block_s, D), lambda h, si, b: (b, h, si, 0))
    scratch = [pltpu.VMEM((block_s, D), jnp.float32),   # cos(angle)
               pltpu.VMEM((block_s, D), jnp.float32)]   # sin(angle) with parity sign

    common = dict(block_b=block_b, gate_on_batch=n_b > 1)

    if mask is None:
        kernel = functools.partial(_rope_kernel, **common)
        in_specs = [offset_spec, pos_spec, freq_spec, x_spec]
        operands = (offset.astype(jnp.float32), pos, freq_signed, x)
        mask_bytes = 0
    else:
        # TODO(synk): PyTorch's where() broadcast would align mask's leading dim with the
        # head axis; we follow the documented intent (mask is per (batch, position) and
        # broadcasts over heads).
        mask_i32 = mask.reshape(B, S, 1).astype(jnp.int32)
        mask_spec = pl.BlockSpec((block_b, block_s, 1), lambda h, si, b: (b, si, 0))
        kernel = functools.partial(_rope_kernel_masked, **common)
        in_specs = [offset_spec, pos_spec, freq_spec, x_spec, mask_spec]
        operands = (offset.astype(jnp.float32), pos, freq_signed, x, mask_i32)
        mask_bytes = B * S * 4

    cost = pl.CostEstimate(
        flops=int(6 * B * H * S * D),
        transcendentals=int(2 * H * n_s * block_s * D),
        bytes_accessed=int(2 * B * H * S * D * x.dtype.itemsize + S * 4 + D * 4
                           + H * 4 + mask_bytes),
    )

    return pl.pallas_call(
        kernel,
        out_shape=jax.ShapeDtypeStruct((B, H, S, D), x.dtype),
        grid=(H, n_s, n_b),                     # batch innermost: trig cache reused
        in_specs=in_specs,
        out_specs=o_spec,
        scratch_shapes=scratch,
        compiler_params=pltpu.CompilerParams(
            dimension_semantics=("parallel", "parallel", "arbitrary")),
        cost_estimate=cost,
    )(*operands)


# ---------------------------------------------------------------------------
# Pure-JAX reference (mirrors the PyTorch forward; per-batch mask over heads).
# ---------------------------------------------------------------------------
def temporal_rope_ref(x, offset, mask, *, num_timesteps, base=1000.0):
    B, H, S, D = x.shape
    half = D // 2
    num_nodes = S // num_timesteps
    positions = jnp.repeat(jnp.arange(num_timesteps, dtype=jnp.float32), num_nodes)
    freqs = 1.0 / (base ** (2.0 * jnp.arange(half, dtype=jnp.float32) / D))
    shifted = positions[None, :] + offset[:, None]                    # [H, S]
    angle = shifted[:, :, None] * freqs[None, None, :]                # [H, S, half]
    cos_t = jnp.broadcast_to(jnp.cos(angle)[None], (B, H, S, half))
    sin_t = jnp.broadcast_to(jnp.sin(angle)[None], (B, H, S, half))
    if mask is not None:
        m = mask.reshape(B, 1, S, 1)
        cos_t = jnp.where(m, cos_t, jnp.ones_like(cos_t))
        sin_t = jnp.where(m, sin_t, jnp.zeros_like(sin_t))
    t1 = x[..., 0::2]
    t2 = x[..., 1::2]
    r0 = t1 * cos_t - t2 * sin_t
    r1 = t1 * sin_t + t2 * cos_t
    return jnp.stack([r0, r1], axis=-1).reshape(B, H, S, D)


if __name__ == "__main__":
    # Small shapes consistent with the module:
    #   B=2, n_heads=4, num_timesteps=4, num_nodes=4 -> seq_len=16, d_head=128.
    B, H, T, N, D = 2, 4, 4, 4, 128
    S = T * N
    base = 1000.0

    key = jax.random.PRNGKey(0)
    kx, koff, kmask = jax.random.split(key, 3)

    x = jax.random.normal(kx, (B, H, S, D), dtype=jnp.float32)
    # Module zero-inits the offset; use a small non-zero one so the offset path is real.
    offset = 0.1 * jax.random.normal(koff, (H,), dtype=jnp.float32)
    mask = jax.random.bernoulli(kmask, 0.8, (B, S, 1))

    # mask=None path (specialized kernel: no mask input, no blend)
    out0 = jax.block_until_ready(
        temporal_rope_with_offset(x, offset, None, num_timesteps=T, base=base))
    ref0 = temporal_rope_ref(x, offset, None, num_timesteps=T, base=base)
    assert jnp.allclose(out0, ref0, atol=5e-5, rtol=5e-5), "mismatch (no mask)"

    # masked path
    out1 = jax.block_until_ready(
        temporal_rope_with_offset(x, offset, mask, num_timesteps=T, base=base))
    ref1 = temporal_rope_ref(x, offset, mask, num_timesteps=T, base=base)
    assert jnp.allclose(out1, ref1, atol=5e-5, rtol=5e-5), "mismatch (mask)"

    print("KERNEL_OK")
</pallas_src>

<mosaic_0001>
module attributes {stable_mosaic.version = 11 : i64} {
  func.func @_rope_kernel(%arg0: i32, %arg1: i32, %arg2: i32, %arg3: memref<4xf32, #tpu.memory_space<smem>>, %arg4: memref<16x1xf32, #tpu.memory_space<vmem>>, %arg5: memref<1x128xf32, #tpu.memory_space<vmem>>, %arg6: memref<2x1x16x128xf32, #tpu.memory_space<vmem>>, %arg7: memref<2x1x16x128xf32, #tpu.memory_space<vmem>>, %arg8: memref<16x128xf32, #tpu.memory_space<vmem>>, %arg9: memref<16x128xf32, #tpu.memory_space<vmem>>) attributes {dimension_semantics = [#tpu.dimension_semantics<parallel>, #tpu.dimension_semantics<parallel>, #tpu.dimension_semantics<arbitrary>], iteration_bounds = array<i64: 4, 1, 1>, scalar_prefetch = 0 : i64, scratch_operands = 2 : i64, tpu.core_type = #tpu.core_type<tc>, window_params = [{transform_indices = @transform_0, window_bounds = array<i64: 4>}, {transform_indices = @transform_1, window_bounds = array<i64: 16, 1>}, {pipeline_mode = #tpu.pipeline_mode<synchronous>, transform_indices = @transform_2, window_bounds = array<i64: 1, 128>}, {transform_indices = @transform_3, window_bounds = array<i64: 2, 1, 16, 128>}, {transform_indices = @transform_4, window_bounds = array<i64: 2, 1, 16, 128>}]} {
    %c0 = arith.constant 0 : index
    %c0_0 = arith.constant 0 : index
    %0 = vector.load %arg4[%c0, %c0_0] : memref<16x1xf32, #tpu.memory_space<vmem>>, vector<16x1xf32>
    %1 = arith.index_cast %arg0 : i32 to index
    %2 = memref.load %arg3[%1] : memref<4xf32, #tpu.memory_space<smem>>
    %3 = vector.broadcast %2 : f32 to vector<16x1xf32>
    %4 = arith.addf %0, %3 : vector<16x1xf32>
    %c0_1 = arith.constant 0 : index
    %c0_2 = arith.constant 0 : index
    %5 = vector.load %arg5[%c0_1, %c0_2] : memref<1x128xf32, #tpu.memory_space<vmem>>, vector<1x128xf32>
    %6 = vector.broadcast %4 : vector<16x1xf32> to vector<16x128xf32>
    %7 = vector.broadcast %5 : vector<1x128xf32> to vector<16x128xf32>
    %8 = arith.mulf %6, %7 : vector<16x128xf32>
    %9 = math.cos %8 : vector<16x128xf32>
    %c0_3 = arith.constant 0 : index
    %c0_4 = arith.constant 0 : index
    %10 = vector.load %arg8[%c0_3, %c0_4] : memref<16x128xf32, #tpu.memory_space<vmem>>, vector<16x128xf32>
    tpu.vector_store %arg8[%c0_3, %c0_4], %9 {strides = array<i32>} : memref<16x128xf32, #tpu.memory_space<vmem>>, vector<16x128xf32>,
    %11 = math.sin %8 : vector<16x128xf32>
    %c0_5 = arith.constant 0 : index
    %c0_6 = arith.constant 0 : index
    %12 = vector.load %arg9[%c0_5, %c0_6] : memref<16x128xf32, #tpu.memory_space<vmem>>, vector<16x128xf32>
    tpu.vector_store %arg9[%c0_5, %c0_6], %11 {strides = array<i32>} : memref<16x128xf32, #tpu.memory_space<vmem>>, vector<16x128xf32>,
    %13 = tpu.iota {dimensions = array<i32: 1>} : vector<1x128xi32>
    %c2_i32 = arith.constant 2 : i32
    %c0_i32 = arith.constant 0 : i32
    %14 = arith.cmpi eq, %c2_i32, %c0_i32 : i32
    %c1_i32 = arith.constant 1 : i32
    %15 = arith.select %14, %c1_i32, %c2_i32 : i32
    %16 = vector.broadcast %15 : i32 to vector<1x128xi32>
    %17 = arith.remsi %13, %16 : vector<1x128xi32>
    %c0_i32_7 = arith.constant 0 : i32
    %18 = vector.broadcast %c0_i32_7 : i32 to vector<1x128xi32>
    %19 = arith.cmpi ne, %17, %18 : vector<1x128xi32>
    %c0_i32_8 = arith.constant 0 : i32
    %20 = vector.broadcast %c0_i32_8 : i32 to vector<1x128xi32>
    %21 = arith.cmpi slt, %17, %20 : vector<1x128xi32>
    %c0_i32_9 = arith.constant 0 : i32
    %22 = arith.cmpi slt, %15, %c0_i32_9 : i32
    %23 = vector.broadcast %22 : i1 to vector<1x128xi1>
    %24 = vector.broadcast %23 : vector<1x128xi1> to vector<1x128xi1>
    %25 = arith.xori %21, %24 : vector<1x128xi1>
    %26 = arith.andi %25, %19 : vector<1x128xi1>
    %27 = vector.broadcast %15 : i32 to vector<1x128xi32>
    %28 = arith.addi %17, %27 : vector<1x128xi32>
    %29 = arith.select %26, %28, %17 : vector<1x128xi1>, vector<1x128xi32>
    %c0_i32_10 = arith.constant 0 : i32
    %30 = vector.broadcast %c0_i32_10 : i32 to vector<1x128xi32>
    %31 = arith.cmpi eq, %29, %30 : vector<1x128xi32>
    %c0_11 = arith.constant 0 : index
    %c0_12 = arith.constant 0 : index
    %32 = vector.load %arg8[%c0_11, %c0_12] : memref<16x128xf32, #tpu.memory_space<vmem>>, vector<16x128xf32>
    %c0_13 = arith.constant 0 : index
    %c0_14 = arith.constant 0 : index
    %33 = vector.load %arg9[%c0_13, %c0_14] : memref<16x128xf32, #tpu.memory_space<vmem>>, vector<16x128xf32>
    %c0_15 = arith.constant 0 : index
    %c0_16 = arith.constant 0 : index
    %c0_17 = arith.constant 0 : index
    %c0_18 = arith.constant 0 : index
    %34 = vector.load %arg6[%c0_15, %c0_16, %c0_17, %c0_18] : memref<2x1x16x128xf32, #tpu.memory_space<vmem>>, vector<1x1x16x128xf32>
    %35 = vector.shape_cast %34 : vector<1x1x16x128xf32> to vector<16x128xf32>
    %c127_i32 = arith.constant 127 : i32
    %36 = tpu.dynamic_rotate %35 by %c127_i32 dim 1 : vector<16x128xf32>, i32 -> vector<16x128xf32>
    %c1_i32_19 = arith.constant 1 : i32
    %37 = tpu.dynamic_rotate %35 by %c1_i32_19 dim 1 : vector<16x128xf32>, i32 -> vector<16x128xf32>
    %38 = vector.shape_cast %31 : vector<1x128xi1> to vector<1x128xi1>
    %39 = vector.broadcast %38 : vector<1x128xi1> to vector<16x128xi1>
    %40 = arith.select %39, %36, %37 : vector<16x128xi1>, vector<16x128xf32>
    %41 = arith.mulf %35, %32 : vector<16x128xf32>
    %42 = arith.mulf %40, %33 : vector<16x128xf32>
    %43 = arith.addf %41, %42 : vector<16x128xf32>
    %c0_20 = arith.constant 0 : index
    %c0_21 = arith.constant 0 : index
    %c0_22 = arith.constant 0 : index
    %c0_23 = arith.constant 0 : index
    %44 = vector.load %arg7[%c0_20, %c0_21, %c0_22, %c0_23] : memref<2x1x16x128xf32, #tpu.memory_space<vmem>>, vector<1x1x16x128xf32>
    %45 = vector.shape_cast %44 : vector<1x1x16x128xf32> to vector<16x128xf32>
    %46 = vector.shape_cast %43 : vector<16x128xf32> to vector<1x1x16x128xf32>
    tpu.vector_store %arg7[%c0_20, %c0_21, %c0_22, %c0_23], %46 {strides = array<i32>} : memref<2x1x16x128xf32, #tpu.memory_space<vmem>>, vector<1x1x16x128xf32>,
    %c1 = arith.constant 1 : index
    %c0_24 = arith.constant 0 : index
    %c0_25 = arith.constant 0 : index
    %c0_26 = arith.constant 0 : index
    %47 = vector.load %arg6[%c1, %c0_24, %c0_25, %c0_26] : memref<2x1x16x128xf32, #tpu.memory_space<vmem>>, vector<1x1x16x128xf32>
    %48 = vector.shape_cast %47 : vector<1x1x16x128xf32> to vector<16x128xf32>
    %c127_i32_27 = arith.constant 127 : i32
    %49 = tpu.dynamic_rotate %48 by %c127_i32_27 dim 1 : vector<16x128xf32>, i32 -> vector<16x128xf32>
    %c1_i32_28 = arith.constant 1 : i32
    %50 = tpu.dynamic_rotate %48 by %c1_i32_28 dim 1 : vector<16x128xf32>, i32 -> vector<16x128xf32>
    %51 = vector.shape_cast %31 : vector<1x128xi1> to vector<1x128xi1>
    %52 = vector.broadcast %51 : vector<1x128xi1> to vector<16x128xi1>
    %53 = arith.select %52, %49, %50 : vector<16x128xi1>, vector<16x128xf32>
    %54 = arith.mulf %48, %32 : vector<16x128xf32>
    %55 = arith.mulf %53, %33 : vector<16x128xf32>
    %56 = arith.addf %54, %55 : vector<16x128xf32>
    %c1_29 = arith.constant 1 : index
    %c0_30 = arith.constant 0 : index
    %c0_31 = arith.constant 0 : index
    %c0_32 = arith.constant 0 : index
    %57 = vector.load %arg7[%c1_29, %c0_30, %c0_31, %c0_32] : memref<2x1x16x128xf32, #tpu.memory_space<vmem>>, vector<1x1x16x128xf32>
    %58 = vector.shape_cast %57 : vector<1x1x16x128xf32> to vector<16x128xf32>
    %59 = vector.shape_cast %56 : vector<16x128xf32> to vector<1x1x16x128xf32>
    tpu.vector_store %arg7[%c1_29, %c0_30, %c0_31, %c0_32], %59 {strides = array<i32>} : memref<2x1x16x128xf32, #tpu.memory_space<vmem>>, vector<1x1x16x128xf32>,
    return
  }
  func.func @transform_0(%arg0: i32, %arg1: i32, %arg2: i32) -> i32 {
    %c0_i32 = arith.constant 0 : i32
    %c0_i32_0 = arith.constant 0 : i32
    return %c0_i32 : i32
  }
  func.func @transform_1(%arg0: i32, %arg1: i32, %arg2: i32) -> (i32, i32) {
    %c0_i32 = arith.constant 0 : i32
    %c0_i32_0 = arith.constant 0 : i32
    return %arg1, %c0_i32 : i32, i32
  }
  func.func @transform_2(%arg0: i32, %arg1: i32, %arg2: i32) -> (i32, i32) {
    %c0_i32 = arith.constant 0 : i32
    %c0_i32_0 = arith.constant 0 : i32
    %c0_i32_1 = arith.constant 0 : i32
    return %c0_i32, %c0_i32_0 : i32, i32
  }
  func.func @transform_3(%arg0: i32, %arg1: i32, %arg2: i32) -> (i32, i32, i32, i32) {
    %c0_i32 = arith.constant 0 : i32
    %c0_i32_0 = arith.constant 0 : i32
    return %arg2, %arg0, %arg1, %c0_i32 : i32, i32, i32, i32
  }
  func.func @transform_4(%arg0: i32, %arg1: i32, %arg2: i32) -> (i32, i32, i32, i32) {
    %c0_i32 = arith.constant 0 : i32
    %c0_i32_0 = arith.constant 0 : i32
    return %arg2, %arg0, %arg1, %c0_i32 : i32, i32, i32, i32
  }
}

</mosaic_0001>

<bundles_post_ra>
// kernel: tpu_custom_call.1
= control target key start
LH: loop header
LB: loop body
LE: loop exit
PB: predicated region body
PF: predicated region fallthrough
CT: control target
= control target key end

     0   :  { %s1850_s0 = inlined_call_operand.vmem [shape: f32[4], index: 0, kind: input, shape index: {}]   ;;  %s1851_s1 = inlined_call_operand.vmem [shape: f32[16,1], index: 1, kind: input, shape index: {}]   ;;  %s1852_s2 = inlined_call_operand.vmem [shape: f32[1,128], index: 2, kind: input, shape index: {}]   ;;  %s1853_s3 = inlined_call_operand.hbm [shape: f32[2,4,16,128], index: 3, kind: input, shape index: {}]   ;;  %s1854_s4 = inlined_call_operand.hbm [shape: f32[2,4,16,128], index: 4, kind: output, shape index: {}]  }
   0x1   :  { %1855 = sst [smem:[#allocation18_spill]] %s1850_s0 }
   0x2   :  { %9 = vsyncpa [#allocation7], 0 }
   0x3   :  { %10 = vsyncpa [#allocation5], 0 }
   0x4   :  { %12 = vsyncpa [#allocation5 + $0x1], 0 }
   0x5   :  { %13 = vsyncpa [#allocation6], 0 }
   0x6   :  { %15 = vsyncpa [#allocation6 + $0x1], 0  ;;  %s1453_s15 = smov 0   ;;  %s1455_s16 = smov 0  }
   0x7   :  { %s1457_s17 = smov 0   ;;  %s1459_s18 = smov 0  }
   0x8   :  { %s1461_s19 = smov 0   ;;  %s1463_s20 = smov 0  }
   0x9 LB: > { %s1187_s21 = sadd.s32 4294967295, %s1403_s20   ;;  %s1188_s22 = sadd.s32 4294967294, %s1403_s20   ;;  %s1403_s20 = sphi %s1463_s20, %s21_s20   ;;  %s1399_s19 = sphi %s1461_s19, %s1871_s19   ;;  %s1395_s18 = sphi %s1459_s18, %s1870_s18   ;;  %s1391_s17 = sphi %s1457_s17, %s1869_s17   ;;  %s1387_s16 = sphi %s1455_s16, %s1868_s16   ;;  %s1383_s15 = sphi %s1453_s15, %s1867_s15  }
   0xa   : > { %s40_s23 = sadd.s32 1, %s1399_s19  ;;  %s119_s24 = sadd.s32 1, %s1391_s17 }
   0xb   : > { %p42_p0 = scmp.ge.s32.totalorder %s40_s23, 4  ;;  %p126_p1 = scmp.ne.s32.totalorder %s1391_s17, %s1387_s16 }
   0xc   : > { %p127_p2 = scmp.eq.s32.totalorder %s1403_s20, 0  ;;  %p132_p3 = scmp.ne.s32.totalorder %s1387_s16, %s1383_s15 }
   0xd   : > { %s1873_s23 = smov (%p42_p0, %s40_s23), 0  ;;  %p1498_p5 = scmp.eq.s32.totalorder %s1187_s21, 0 }
   0xe   : > { %p1494_p4 = por %p127_p2, %p126_p1  ;;  %s113_s27 = ssub.s32 %s1399_s19, %s1873_s23 }
   0xf   : > { %p160_p6 = scmp.eq.s32.totalorder %s1187_s21, 3  ;;  %p117_p7 = scmp.eq.s32.totalorder %s113_s27, 0 }
  0x10   : > { %p1506_p8 = por %p1498_p5, %p132_p3  ;;  %p166_p10 = scmp.eq.s32.totalorder %s1188_s22, 3 }
  0x11   : > { %p1510_p9 = por %p160_p6, %p126_p1  ;;  %p1189_p12 = scmp.ge.s32.totalorder %s1403_s20, 1 }
  0x12   : > { %s1515_s30 = scalar_select %p117_p7, %s1391_s17, %s119_s24  }
  0x13   : > { %p1517_p11 = por %p166_p10, %p132_p3  ;;  %p173_p13 = scmp.lt.s32.totalorder %s1403_s20, 5 }
  0x14   : > { %s1862_s0 = sld [smem:[#allocation18_spill]]  ;;  %s1405_s10 = smov [#allocation4]  }
  0x15   : > { %p1523_p0 = pnand %p1189_p12, %p173_p13  ;;  %p1192_p3 = scmp.ge.s32.totalorder %s1403_s20, 4 }
  0x17   : > { %p1246_p1 = pneg %p1523_p0  ;;  %204 = sbr.rel (%p1192_p3) target bundleno = 42 (0x2a), region = 28 }
  0x19   : > { %p1247_p2 = pnand %p1246_p1, %p1498_p5 }
  0x1a   : > { %s185_s9 = sshll.u32 %s1862_s0, 4  ;;  %s186_s9 = int_to_ptr.vmem [resolvable:$true] %s185_s9 }
  0x1b   : > { %1249 = dma.vmem_to_smem (!%p1247_p2), %s186_s9, 16, %s1405_s10, [#allocation7]  }
  0x1c   : > { %s208_s11 = sand.u32 1, %s1391_s17   ;;  %s1223_s12 = sshll.u32 %s1399_s19, 4 }
  0x1d   : > { %s1193_s13 = sshll.u32 %s208_s11, 5  ;;  %s222_s22 = scalar_lea.hbm %s1853_s3, %s1223_s12 }
  0x1e   : > { %s1227_s24 = scalar_select %p1494_p4, [#allocation0], [#allocation14] }
  0x1f   : > { %s235_s27 = sshll.u32 %s222_s22, 4  ;;  %s212_s7 = scalar_lea.vmem [#allocation8], %s1193_s13  ;;  %s236_s27 = int_to_ptr.hbm [resolvable:$true] %s235_s27 }
  0x20   : > { %s237_s8 = sshll.u32 %s212_s7, 4  ;;  %s227_s9 = sld [smem:[%s1227_s24]]   ;;  %s238_s8 = int_to_ptr.vmem [resolvable:$true] %s237_s8 }
  0x21   : > { %s1406_s10 = smov 1024   ;;  %s1407_s0 = smov 256  }
  0x22   : > { %1228 = sst [smem:[#allocation11]] (%p1494_p4), %s1406_s10  ;;  %s1408_s14 = smov 2  }
  0x23   : > { %1229 = sst [smem:[#allocation11 + $0x1]] (%p1494_p4), %s1407_s0  ;;  %s1409_s12 = smov 128  }
  0x24   : > { %1230 = sst [smem:[#allocation11 + $0x2]] (%p1494_p4), %s1408_s14  ;;  %s1410_s22 = smov 8  }
  0x25   : > { %1231 = sst [smem:[#allocation11 + $0x3]] (%p1494_p4), %s1409_s12  ;;  %s209_s24 = scalar_lea.sflag [#allocation5], %s208_s11 }
  0x26   : > { %s1196_s21 = sshll.u32 %s227_s9, 26  ;;  %1232 = sst [smem:[#allocation11 + $0x4]] (%p1494_p4), %s1409_s12 }
  0x27   : > { %s1197_s13 = sadd.s32 134217728, %s1196_s21  ;;  %1233 = sst [smem:[#allocation11 + $0x5]] (%p1494_p4), %s1410_s22 }
  0x28   : > { %s1411_s7 = smov [#allocation10]  }
  0x29   : > { %1234 = dma.general (%p1494_p4), %s236_s27, 512, %s238_s8, %s209_s24, %s1411_s7, [#allocation11], %s1197_s13, 0  }
  0x2a PF: > { %262 = sbr.rel (%p1523_p0) target bundleno = 310 (0x136), region = 36 }
  0x2f   : > { %1370 = dma.done.wait (%p1498_p5), [#allocation7], 16  }
  0x30   : > { %1372 = vsyncadd (%p1498_p5), [#allocation7], 4294967280  ;;  %s1563_s0 = sand.u32 1, %s1387_s16  }
  0x31   : > { %s1200_s11 = sshll.u32 %s1563_s0, 5  ;;  %s270_s25 = scalar_lea.sflag [#allocation5], %s1563_s0 }
  0x32   : > { %s273_s27 = scalar_lea.vmem [#allocation8], %s1200_s11 }
  0x33   : > { %1374 = dma.done.wait (%p1506_p8), %s270_s25, 512  }
  0x34   : > { %1376 = vsyncadd (%p1506_p8), %s270_s25, 4294966784 }
  0x35   : > { %279 = sfence }
  0x36   : > { %s317_s26 = sld [smem:[#allocation4 + %s1395_s18]]  ;;  %v1574_v0 = vld [vmem:[%s273_s27] sm:$0xff]  ;;  %v1412_v1 = vmov 0   ;;  %s1413_s6 = smov 127   ;;  %v1582_v4 = vld [vmem:[%s273_s27 + $0x8] sm:$0xff]  ;;  %v1589_v8 = vld [vmem:[%s273_s27 + $0x18] sm:$0xff] }
  0x37   : > { %1328 = vset.pattern.permute.xlu0 %v1412_v1  ;;  %980 = vrot.lane.b32.xlu1 %v1574_v0, %s1413_s6  ;;  %s1414_s8 = smov 1   ;;  %v315_v2 = vld [vmem:[%s1851_s1] sm:$0xff]  ;;  %v316_v6 = vld [vmem:[%s1851_s1 + $0x8] sm:$0xff]  ;;  %v1591_v9 = vld [vmem:[%s273_s27 + $0x10] sm:$0xff]  ;;  %v1415_v29 = vmov 683565275  }
  0x38   : > { %984 = vrot.lane.b32.xlu2 %v1574_v0, %s1414_s8  ;;  %v1329_v10 = vld [vmem:[%s1852_s2] ss:$0 sm:$0xff]  ;;  %v1416_v31 = vmov 2475754826   ;;  %v1417_v35 = vmov 2131351028  }
  0x39   : > { %v1418_v38 = vmov 2102212464   ;;  %v1419_v41 = vmov 920167782   ;;  %v1420_v44 = vmov 1326507024  }
  0x3a   : > { %s304_s13 = scalar_lea.vmem [#allocation9], %s1200_s11  ;;  %s1023_s22 = scalar_lea.sflag [#allocation6], %s1563_s0 }
  0x3c   : > { %v318_v3 = vstv %s317_s26 }
  0x3d   : > { %v319_v5 = vadd.f32 %v318_v3, %v315_v2  ;;  %v320_v7 = vadd.f32 %v318_v3, %v316_v6 }
  0x3f   : > { %324 = vperm.xlu0 %1328, %v319_v5   ;;  %982 = vrot.lane.b32.xlu1 %v1582_v4, %s1413_s6 }
  0x40   : > { %986 = vrot.lane.b32.xlu2 %v1582_v4, %s1414_s8 }
  0x47   : > { %329 = vperm.xlu0 %1328, %v320_v7   ;;  %1005 = vrot.lane.b32.xlu1 %v1589_v8, %s1413_s6 }
  0x48   : > { %1007 = vrot.lane.b32.xlu2 %v1591_v9, %s1414_s8 }
  0x4f   : > { %1003 = vrot.lane.b32.xlu0 %v1591_v9, %s1413_s6 }
  0x57   : > { %1009 = vrot.lane.b32.xlu0 %v1589_v8, %s1414_s8 }
  0xb1   : > { %v325_v11 = vpop.permute.xlu0 %324 }
  0xb2   : > { %v1600_v12 = vmul.f32 %v1329_v10, %v325_v11 }
  0xb4   : > { %v340_v13 = vand.u32 2139095040, %v1600_v12  ;;  %v337_v15 = vand.u32 2147483647, %v1600_v12 }
  0xb6   : > { %v341_v14 = vshrl.u32 %v340_v13, 23  ;;  %v344_v20 = vand.u32 8388607, %v337_v15 }
  0xb8   : > { %v1202_v16 = vadd.s32 4294967169, %v341_v14  ;;  %v345_v25 = vor.u32 8388608, %v344_v20 }
  0xb9   : > { %v330_v17 = vpop.permute.xlu0 %329 }
  0xba   : > { %v347_v18 = vadd.s32 1, %v1202_v16  ;;  %v1604_v19 = vmul.f32 %v1329_v10, %v330_v17  ;;  %v1622_v53 = vshll.u32 %v345_v25, 8 }
  0xbc   : > { %vm348_vm0 = vcmp.gt.s32.totalorder %v347_v18, 0  ;;  %v491_v22 = vand.u32 2147483647, %v1604_v19  ;;  %v494_v23 = vand.u32 2139095040, %v1604_v19  ;;  %v1634_v63 = vand.u32 65535, %v1622_v53 }
  0xbd   : > { %v349_v21 = vsel %vm348_vm0, %v347_v18, 0  ;;  %v387_v16 = vshrl.u32 %v1622_v53, 16 }
  0xbe   : > { %v351_v24 = vand.u32 31, %v349_v21  ;;  %v495_v27 = vshrl.u32 %v494_v23, 23  ;;  %v1610_v28 = vshrl.u32 %v349_v21, 5  ;;  %v498_v33 = vand.u32 8388607, %v491_v22 }
  0xc0   : > { %v352_v26 = vsub.s32 32, %v351_v24  ;;  %v354_v30 = vshll.u32 %v1415_v29, %v351_v24  ;;  %v357_v32 = vshll.u32 %v1416_v31, %v351_v24  ;;  %v360_v37 = vshll.u32 %v1417_v35, %v351_v24 }
  0xc1   : > { %v363_v40 = vshll.u32 %v1418_v38, %v351_v24  ;;  %v366_v43 = vshll.u32 %v1419_v41, %v351_v24  ;;  %v1205_v49 = vadd.s32 4294967169, %v495_v27  ;;  %vm369_vm1 = vcmp.lt.s32.totalorder %v1610_v28, 1 }
  0xc2   : > { %v355_v34 = vshrl.u32 %v1416_v31, %v352_v26  ;;  %v358_v36 = vshrl.u32 %v1417_v35, %v352_v26  ;;  %v361_v39 = vshrl.u32 %v1418_v38, %v352_v26  ;;  %v364_v42 = vshrl.u32 %v1419_v41, %v352_v26 }
  0xc3   : > { %v367_v45 = vshrl.u32 %v1420_v44, %v352_v26  ;;  %vm371_vm2 = vcmp.lt.s32.totalorder %v1610_v28, 3  ;;  %vm372_vm3 = vcmp.lt.s32.totalorder %v1610_v28, 4  ;;  %v499_v56 = vor.u32 8388608, %v498_v33 }
  0xc4   : > { %v356_v46 = vor.u32 %v355_v34, %v354_v30  ;;  %v359_v47 = vor.u32 %v358_v36, %v357_v32  ;;  %v362_v48 = vor.u32 %v361_v39, %v360_v37  ;;  %v365_v50 = vor.u32 %v364_v42, %v363_v40 }
  0xc5   : > { %v368_v51 = vor.u32 %v367_v45, %v366_v43  ;;  %v501_v57 = vadd.s32 1, %v1205_v49  ;;  %vm370_vm4 = vcmp.lt.s32.totalorder %v1610_v28, 2  ;;  %v353_v5 = vshrl.u32 %v1415_v29, %v352_v26 }
  0xc6   : > { %v381_v52 = vsel %vm369_vm1, %v359_v47, %v362_v48  ;;  %v378_v54 = vsel %vm372_vm3, %v365_v50, 920167782  ;;  %v377_v58 = vsel %vm369_vm1, %v356_v46, %v359_v47  ;;  %v374_v62 = vsel %vm372_vm3, %v362_v48, 2102212464 }
  0xc7   : > { %v382_v55 = vsel %vm372_vm3, %v368_v51, 1326507024  ;;  %v379_v59 = vsel %vm371_vm2, %v362_v48, %v378_v54  ;;  %vm502_vm5 = vcmp.gt.s32.totalorder %v501_v57, 0  ;;  %v1641_v10 = vshll.u32 %v499_v56, 8 }
  0xc8   : > { %v383_v60 = vsel %vm371_vm2, %v365_v50, %v382_v55  ;;  %v1639_v6 = vsel %vm370_vm4, %v377_v58, %v379_v59  ;;  %v503_v7 = vsel %vm502_vm5, %v501_v57, 0  ;;  %v373_v13 = vsel %vm369_vm1, %v353_v5, %v356_v46 }
  0xc9   : > { %v384_v61 = vsel %vm370_vm4, %v381_v52, %v383_v60  ;;  %v375_v14 = vsel %vm371_vm2, %v359_v47, %v374_v62  ;;  %v410_v20 = vand.u32 65535, %v1639_v6  ;;  %v505_v21 = vand.u32 31, %v503_v7 }
  0xca   : > { %v388_v2 = vand.u32 65535, %v384_v61  ;;  %v389_v3 = vshrl.u32 %v384_v61, 16  ;;  %v411_v24 = vshrl.u32 %v1639_v6, 16  ;;  %v1658_v25 = vand.u32 65535, %v1641_v10 }
  0xcb   : > { %v1661_v26 = vshrl.u32 %v1641_v10, 16  ;;  %v1663_v30 = vshrl.u32 %v503_v7, 5  ;;  %v1665_v32 = vsub.s32 32, %v505_v21  ;;  %v508_v36 = vshll.u32 %v1415_v29, %v505_v21 }
  0xcc   : > { %v1644_v11 = vmul.u32 %v389_v3, %v1634_v63  ;;  %v390_v17 = vmul.u32 %v388_v2, %v1634_v63  ;;  %v1654_v23 = vmul.u32 %v388_v2, %v387_v16  ;;  %v393_v27 = vmul.u32 %v389_v3, %v387_v16 }
  0xcd   : > { %v511_v37 = vshll.u32 %v1416_v31, %v505_v21  ;;  %v509_v39 = vshrl.u32 %v1416_v31, %v1665_v32  ;;  %v512_v40 = vshrl.u32 %v1417_v35, %v1665_v32  ;;  %v514_v42 = vshll.u32 %v1417_v35, %v505_v21 }
  0xce   : > { %v394_v18 = vshll.u32 %v1644_v11, 16  ;;  %v517_v43 = vshll.u32 %v1418_v38, %v505_v21  ;;  %v515_v45 = vshrl.u32 %v1418_v38, %v1665_v32  ;;  %v518_v46 = vshrl.u32 %v1419_v41, %v1665_v32 }
  0xcf   : > { %v520_v47 = vshll.u32 %v1419_v41, %v505_v21  ;;  %v521_v48 = vshrl.u32 %v1420_v44, %v1665_v32  ;;  %v396_v49 = vshll.u32 %v1654_v23, 16  ;;  %v1677_v51 = vor.u32 %v509_v39, %v508_v36 }
  0xd0   : > { %vm398_vm6 = vc.u32 %v390_v17, %v394_v18  ;;  %v400_v34 = vadd.s32 %v394_v18, %v390_v17  ;;  %v1679_v52 = vor.u32 %v512_v40, %v511_v37  ;;  %v1681_v54 = vor.u32 %v515_v45, %v514_v42 }
  0xd1   : > { %v399_v33 = vsel %vm398_vm6, 1, %v1412_v1  ;;  %v519_v31 = vor.u32 %v518_v46, %v517_v43  ;;  %v522_v55 = vor.u32 %v521_v48, %v520_v47  ;;  %vm523_vm7 = vcmp.lt.s32.totalorder %v1663_v30, 1 }
  0xd2   : > { %v401_v50 = vadd.s32 %v399_v33, %v393_v27  ;;  %v413_v35 = vmul.u32 %v411_v24, %v1634_v63  ;;  %vm526_vm8 = vcmp.lt.s32.totalorder %v1663_v30, 4  ;;  %v531_v38 = vsel %vm523_vm7, %v1677_v51, %v1679_v52 }
  0xd3   : > { %vm402_vm9 = vc.u32 %v400_v34, %v396_v49  ;;  %vm525_vm10 = vcmp.lt.s32.totalorder %v1663_v30, 3  ;;  %v532_v41 = vsel %vm526_vm8, %v519_v31, 920167782  ;;  %v535_v44 = vsel %vm523_vm7, %v1679_v52, %v1681_v54 }
  0xd4   : > { %v536_v56 = vsel %vm526_vm8, %v522_v55, 1326507024  ;;  %vm524_vm11 = vcmp.lt.s32.totalorder %v1663_v30, 2  ;;  %v533_v57 = vsel %vm525_vm10, %v1681_v54, %v532_v41  ;;  %v403_v59 = vsel %vm402_vm9, 1, %v1412_v1 }
  0xd5   : > { %v537_v58 = vsel %vm525_vm10, %v519_v31, %v536_v56  ;;  %v414_v60 = vmul.u32 %v410_v20, %v387_v16  ;;  %v534_v61 = vsel %vm524_vm11, %v531_v38, %v533_v57  ;;  %v405_v2 = vadd.s32 %v403_v59, %v401_v50 }
  0xd6   : > { %v538_v62 = vsel %vm524_vm11, %v535_v44, %v537_v58  ;;  %v565_v6 = vshrl.u32 %v534_v61, 16  ;;  %v416_v7 = vshll.u32 %v413_v35, 16  ;;  %v1712_v17 = vsel %vm370_vm4, %v373_v13, %v375_v14 }
  0xd7   : > { %v542_v3 = vand.u32 65535, %v538_v62  ;;  %v543_v5 = vshrl.u32 %v538_v62, 16  ;;  %v564_v18 = vand.u32 65535, %v534_v61  ;;  %v395_v21 = vshrl.u32 %v1644_v11, 16 }
  0xd8   : > { %v412_v27 = vmul.u32 %v410_v20, %v1634_v63  ;;  %v415_v33 = vmul.u32 %v411_v24, %v387_v16  ;;  %v567_v37 = vmul.u32 %v565_v6, %v1658_v25  ;;  %v397_v39 = vshrl.u32 %v1654_v23, 16 }
  0xd9   : > { %v545_v34 = vmul.u32 %v543_v5, %v1658_v25  ;;  %v546_v36 = vmul.u32 %v542_v3, %v1661_v26  ;;  %v406_v40 = vadd.s32 %v405_v2, %v395_v21  ;;  %v418_v42 = vshll.u32 %v414_v60, 16 }
  0xda   : > { %v544_v28 = vmul.u32 %v542_v3, %v1658_v25  ;;  %v547_v13 = vmul.u32 %v543_v5, %v1661_v26  ;;  %vm420_vm12 = vc.u32 %v412_v27, %v416_v7  ;;  %v568_v63 = vmul.u32 %v564_v18, %v1661_v26 }
  0xdb   : > { %v548_v14 = vshll.u32 %v545_v34, 16  ;;  %v550_v11 = vshll.u32 %v546_v36, 16  ;;  %v421_v16 = vsel %vm420_vm12, 1, %v1412_v1  ;;  %v422_v20 = vadd.s32 %v416_v7, %v412_v27 }
  0xdc   : > { %v423_v43 = vadd.s32 %v421_v16, %v415_v33  ;;  %v570_v45 = vshll.u32 %v567_v37, 16  ;;  %v566_v46 = vmul.u32 %v564_v18, %v1658_v25  ;;  %v417_v47 = vshrl.u32 %v413_v35, 16 }
  0xdd   : > { %vm552_vm13 = vc.u32 %v544_v28, %v548_v14  ;;  %v554_v24 = vadd.s32 %v548_v14, %v544_v28  ;;  %vm424_vm14 = vc.u32 %v422_v20, %v418_v42  ;;  %v569_v49 = vmul.u32 %v565_v6, %v1661_v26 }
  0xde   : > { %v553_v23 = vsel %vm552_vm13, 1, %v1412_v1  ;;  %v425_v50 = vsel %vm424_vm14, 1, %v1412_v1  ;;  %v407_v31 = vadd.s32 %v406_v40, %v397_v39  ;;  %v549_v38 = vshrl.u32 %v545_v34, 16 }
  0xdf   : > { %v555_v48 = vadd.s32 %v553_v23, %v547_v13  ;;  %vm556_vm15 = vc.u32 %v554_v24, %v550_v11  ;;  %v427_v55 = vadd.s32 %v425_v50, %v423_v43  ;;  %v572_v56 = vshll.u32 %v568_v63, 16 }
  0xe0   : > { %v557_v41 = vsel %vm556_vm15, 1, %v1412_v1  ;;  %vm574_vm0 = vc.u32 %v566_v46, %v570_v45  ;;  %v576_v57 = vadd.s32 %v570_v45, %v566_v46  ;;  %v528_v25 = vsel %vm526_vm8, %v1681_v54, 2102212464 }
  0xe1   : > { %v559_v44 = vadd.s32 %v557_v41, %v555_v48  ;;  %v419_v35 = vshrl.u32 %v414_v60, 16  ;;  %v428_v58 = vadd.s32 %v427_v55, %v417_v47  ;;  %v575_v26 = vsel %vm574_vm0, 1, %v1412_v1 }
  0xe2   : > { %v426_v59 = vadd.s32 %v422_v20, %v418_v42  ;;  %v577_v62 = vadd.s32 %v575_v26, %v569_v49  ;;  %vm578_vm1 = vc.u32 %v576_v57, %v572_v56  ;;  %v507_v2 = vshrl.u32 %v1415_v29, %v1665_v32 }
  0xe3   : > { %v560_v61 = vadd.s32 %v559_v44, %v549_v38  ;;  %v429_v3 = vadd.s32 %v428_v58, %v419_v35  ;;  %v551_v5 = vshrl.u32 %v546_v36, 16  ;;  %v579_v6 = vsel %vm578_vm1, 1, %v1412_v1 }
  0xe4   : > { %vm432_vm2 = vc.u32 %v407_v31, %v426_v59  ;;  %v571_v7 = vshrl.u32 %v567_v37, 16  ;;  %v581_v18 = vadd.s32 %v579_v6, %v577_v62  ;;  %v527_v54 = vsel %vm523_vm7, %v507_v2, %v1677_v51 }
  0xe5   : > { %v529_v60 = vsel %vm525_vm10, %v1679_v52, %v528_v25  ;;  %v433_v21 = vadd.s32 1, %v429_v3  ;;  %v561_v27 = vadd.s32 %v560_v61, %v551_v5  ;;  %v430_v29 = vmul.u32 %v1622_v53, %v1712_v17 }
  0xe6   : > { %v573_v32 = vshrl.u32 %v568_v63, 16  ;;  %v582_v33 = vadd.s32 %v581_v18, %v571_v7  ;;  %v580_v1 = vadd.s32 %v576_v57, %v572_v56  ;;  %v530_v36 = vsel %vm524_vm11, %v527_v54, %v529_v60 }
  0xe7   : > { %v434_v34 = vsel %vm432_vm2, %v433_v21, %v429_v3  ;;  %v584_v42 = vmul.u32 %v1641_v10, %v530_v36  ;;  %v431_v46 = vadd.s32 %v426_v59, %v407_v31  ;;  %v1750_v59 = vpop.permute.xlu2 %984  ;;  %vm339_vm8 = vcmp.lt.s32.totalorder %v1600_v12, 0 }
  0xe8   : > { %v435_v37 = vadd.s32 %v434_v34, %v430_v29  ;;  %v583_v39 = vadd.s32 %v582_v33, %v573_v32  ;;  %vm586_vm3 = vc.u32 %v561_v27, %v580_v1  ;;  %v585_v35 = vadd.s32 %v580_v1, %v561_v27  ;;  %v1756_v34 = vpop.permute.xlu1 %980 }
  0xe9   : > { %vm338_vm9 = vcmp.le.f32.partialorder %v337_v15, 0.7853982  ;;  %vm493_vm10 = vcmp.lt.s32.totalorder %v1604_v19, 0  ;;  %vm1764_vm11 = vcmp.le.f32.partialorder %v491_v22, 0.7853982  ;;  %vm480_vm12 = vweird.f32 %v1600_v12 }
  0xea   : > { %v436_v51 = vadd.s32 536870912, %v435_v37  ;;  %v587_v40 = vadd.s32 1, %v583_v39 }
  0xec   : > { %v437_v52 = vshrl.u32 %v436_v51, 30  ;;  %v588_v28 = vsel %vm586_vm3, %v587_v40, %v583_v39 }
  0xed   : > { %v589_v13 = vadd.s32 %v588_v28, %v584_v42 }
  0xee   : > { %v438_v14 = vshll.u32 %v437_v52, 30  ;;  %v461_v54 = vsub.s32 4, %v437_v52 }
  0xef   : > { %v590_v11 = vadd.s32 536870912, %v589_v13  ;;  %v1760_v42 = vpop.permute.xlu2 %986 }
  0xf0   : > { %v439_v53 = vsub.s32 %v435_v37, %v438_v14  ;;  %v462_v1 = vsel %vm339_vm8, %v461_v54, %v437_v52  ;;  %v959_v14 = vlaneseq }
  0xf1   : > { %v1747_v17 = vshrl.u32 %v590_v11, 30  ;;  %v464_v15 = vsel %vm338_vm9, 0, %v462_v1 }
  0xf2   : > { %vm440_vm4 = vcmp.lt.s32.totalorder %v439_v53, 0  ;;  %v441_v63 = vsub.s32 0, %v439_v53 }
  0xf3   : > { %v592_v30 = vshll.u32 %v1747_v17, 30  ;;  %v615_v40 = vsub.s32 4, %v1747_v17 }
  0xf4   : > { %v442_v16 = vsel %vm440_vm4, %v441_v63, %v439_v53 }
  0xf5   : > { %v443_v20 = vclz %v442_v16  ;;  %v593_v24 = vsub.s32 %v589_v13, %v592_v30  ;;  %v791_v16 = vadd.s32 3, %v464_v15 }
  0xf7   : > { %v1203_v43 = vadd.s32 4294967294, %v443_v20  ;;  %vm594_vm5 = vcmp.lt.s32.totalorder %v593_v24, 0  ;;  %v595_v45 = vsub.s32 0, %v593_v24  ;;  %v616_v20 = vsel %vm493_vm10, %v615_v40, %v1747_v17 }
  0xf9   : > { %vm1204_vm6 = vcmp.lt.s32.totalorder %v1203_v43, 0  ;;  %v596_v23 = vsel %vm594_vm5, %v595_v45, %v593_v24 }
  0xfa   : > { %v446_v10 = vsel %vm1204_vm6, 0, %v1203_v43  ;;  %v597_v49 = vclz %v596_v23  ;;  %v481_v23 = vand.u32 3, %v464_v15 }
  0xfb   : > { %v447_v47 = vsub.s32 32, %v446_v10  ;;  %v451_v48 = vsub.s32 4294967266, %v446_v10  ;;  %v448_v50 = vshll.u32 %v439_v53, %v446_v10  ;;  %v960_v10 = vand.u32 127, %v959_v14 }
  0xfc   : > { %v1206_v41 = vadd.s32 4294967294, %v597_v49  ;;  %v618_v49 = vsel %vm1764_vm11, 0, %v616_v20  ;;  %vm482_vm13 = vcmp.lt.s32.totalorder %v481_v23, 2  ;;  %vm483_vm14 = vcmp.eq.s32.totalorder %v481_v23, 0 }
  0xfd   : > { %v449_v55 = vshrl.u32 %v431_v46, %v447_v47  ;;  %v452_v38 = vadd.s32 127, %v451_v48  ;;  %vm486_vm15 = vcmp.eq.s32.totalorder %v481_v23, 2 }
  0xfe   : > { %vm1207_vm7 = vcmp.lt.s32.totalorder %v1206_v41, 0 }
  0xff   : > { %v450_v44 = vor.u32 %v449_v55, %v448_v50  ;;  %v453_v56 = vshll.u32 %v452_v38, 23  ;;  %v600_v57 = vsel %vm1207_vm7, 0, %v1206_v41  ;;  %v792_v50 = vand.u32 3, %v791_v16  ;;  %v1774_v55 = vpop.permute.xlu1 %982 }
 0x100   : > { %v601_v58 = vsub.s32 32, %v600_v57  ;;  %v605_v26 = vsub.s32 4294967266, %v600_v57  ;;  %v602_v3 = vshll.u32 %v593_v24, %v600_v57  ;;  %v965_v57 = vand.u32 1, %v960_v10 }
 0x101   : > { %v454_v25 = vor.u32 4788187, %v453_v56  ;;  %v457_v62 = vcvt.s32.f32 %v450_v44  ;;  %v1004_v44 = vpop.permute.xlu0 %1003  ;;  %vm793_vm0 = vcmp.lt.s32.totalorder %v792_v50, 2  ;;  %vm794_vm1 = vcmp.eq.s32.totalorder %v792_v50, 0 }
 0x102   : > { %v603_v2 = vshrl.u32 %v585_v35, %v601_v58  ;;  %v606_v31 = vadd.s32 127, %v605_v26  ;;  %v946_v58 = vadd.s32 3, %v618_v49  ;;  %vm797_vm2 = vcmp.eq.s32.totalorder %v792_v50, 2 }
 0x103   : > { %v455_v61 = vand.u32 2147483647, %v454_v25  ;;  %vm1777_vm3 = vcmp.eq.s32.totalorder %v965_v57, 0 }
 0x104   : > { %v604_v6 = vor.u32 %v603_v2, %v602_v3  ;;  %v607_v7 = vshll.u32 %v606_v31, 23  ;;  %v947_v54 = vand.u32 3, %v946_v58  ;;  %v990_v40 = vsel %vm1777_vm3, %v1756_v34, %v1750_v59 }
 0x105   : > { %v458_v5 = vmul.f32 %v457_v62, %v455_v61  ;;  %v1008_v62 = vpop.permute.xlu2 %1007  ;;  %v991_v23 = vsel %vm1777_vm3, %v1774_v55, %v1760_v42 }
 0x106   : > { %v608_v60 = vor.u32 4788187, %v607_v7  ;;  %v611_v32 = vcvt.s32.f32 %v604_v6  ;;  %v635_v6 = vand.u32 3, %v618_v49  ;;  %vm948_vm7 = vcmp.lt.s32.totalorder %v947_v54, 2 }
 0x107   : > { %v459_v18 = vxor.u32 2147483648, %v458_v5  ;;  %v1006_v11 = vpop.permute.xlu1 %1005 }
 0x108   : > { %v609_v29 = vand.u32 2147483647, %v608_v60  ;;  %v1011_v60 = vsel %vm1777_vm3, %v1004_v44, %v1008_v62  ;;  %vm636_vm4 = vcmp.lt.s32.totalorder %v635_v6, 2  ;;  %vm637_vm5 = vcmp.eq.s32.totalorder %v635_v6, 0 }
 0x109   : > { %v460_v21 = vsel %vm339_vm8, %v459_v18, %v458_v5  ;;  %vm640_vm6 = vcmp.eq.s32.totalorder %v635_v6, 2  ;;  %vm949_vm8 = vcmp.eq.s32.totalorder %v947_v54, 0 }
 0x10a   : > { %v463_v27 = vsel %vm338_vm9, %v1600_v12, %v460_v21  ;;  %v612_v36 = vmul.f32 %v611_v32, %v609_v29  ;;  %vm952_vm9 = vcmp.eq.s32.totalorder %v947_v54, 2 }
 0x10b   : > { %v465_v33 = vmul.f32 %v463_v27, %v463_v27 }
 0x10c   : > { %v613_v51 = vxor.u32 2147483648, %v612_v36 }
 0x10d   : > { %v466_v37 = vmul.f32 -0.001358992, %v465_v33  ;;  %v473_v39 = vmul.f32 -0.00019511016, %v465_v33 }
 0x10e   : > { %v614_v52 = vsel %vm493_vm10, %v613_v51, %v612_v36  ;;  %vm634_vm10 = vweird.f32 %v1604_v19 }
 0x10f   : > { %v467_v28 = vadd.f32 0.041655596, %v466_v37  ;;  %v474_v13 = vadd.f32 0.008332121, %v473_v39  ;;  %v617_v30 = vsel %vm1764_vm11, %v1604_v19, %v614_v52  ;;  %v1010_v52 = vpop.permute.xlu0 %1009 }
 0x110   : > { %v619_v24 = vmul.f32 %v617_v30, %v617_v30 }
 0x111   : > { %v468_v53 = vmul.f32 %v467_v28, %v465_v33  ;;  %v475_v63 = vmul.f32 %v474_v13, %v465_v33 }
 0x112   : > { %v620_v46 = vmul.f32 -0.001358992, %v619_v24  ;;  %v627_v22 = vmul.f32 -0.00019511016, %v619_v24 }
 0x113   : > { %v469_v43 = vadd.f32 -0.4999988, %v468_v53  ;;  %v476_v45 = vadd.f32 -0.16666654, %v475_v63 }
 0x114   : > { %v621_v38 = vadd.f32 0.041655596, %v620_v46  ;;  %v628_v41 = vadd.f32 0.008332121, %v627_v22 }
 0x115   : > { %v470_v47 = vmul.f32 %v469_v43, %v465_v33  ;;  %v477_v48 = vmul.f32 %v476_v45, %v465_v33 }
 0x116   : > { %v622_v25 = vmul.f32 %v621_v38, %v619_v24  ;;  %v629_v35 = vmul.f32 %v628_v41, %v619_v24 }
 0x117   : > { %v471_v56 = vadd.f32 1.0, %v470_v47  ;;  %v478_v17 = vadd.f32 1.0, %v477_v48 }
 0x118   : > { %v623_v2 = vadd.f32 -0.4999988, %v622_v25  ;;  %v630_v3 = vadd.f32 -0.16666654, %v629_v35 }
 0x119   : > { %v479_v26 = vmul.f32 %v478_v17, %v463_v27  ;;  %v487_v61 = vxor.u32 2147483648, %v471_v56 }
 0x11a   : > { %v624_v7 = vmul.f32 %v623_v2, %v619_v24  ;;  %v631_v18 = vmul.f32 %v630_v3, %v619_v24 }
 0x11b   : > { %v484_v31 = vxor.u32 2147483648, %v479_v26  ;;  %v488_v27 = vsel %vm486_vm15, %v487_v61, %v479_v26  ;;  %v799_v32 = vsel %vm797_vm2, %v487_v61, %v479_v26 }
 0x11c   : > { %v625_v36 = vadd.f32 1.0, %v624_v7  ;;  %v632_v37 = vadd.f32 1.0, %v631_v18 }
 0x11d   : > { %v485_v21 = vsel %vm483_vm14, %v471_v56, %v484_v31  ;;  %v796_v29 = vsel %vm794_vm1, %v471_v56, %v484_v31 }
 0x11e   : > { %v489_v33 = vsel %vm482_vm13, %v485_v21, %v488_v27  ;;  %v800_v1 = vsel %vm793_vm0, %v796_v29, %v799_v32  ;;  %v633_v13 = vmul.f32 %v632_v37, %v617_v30  ;;  %v641_v14 = vxor.u32 2147483648, %v625_v36 }
 0x11f   : > { %v490_v39 = vsel %vm480_vm12, nan, %v489_v33  ;;  %v801_v51 = vsel %vm480_vm12, nan, %v800_v1 }
 0x120   : > { %v992_v15 = vmul.f32 %v1574_v0, %v490_v39  ;;  %v994_v28 = vmul.f32 %v990_v40, %v801_v51  ;;  %v1013_v53 = vmul.f32 %v1591_v9, %v490_v39  ;;  %v1015_v63 = vmul.f32 %v1011_v60, %v801_v51 }
 0x121   : > { %v638_v16 = vxor.u32 2147483648, %v633_v13  ;;  %v1012_v0 = vsel %vm1777_vm3, %v1006_v11, %v1010_v52  ;;  %v642_v30 = vsel %vm640_vm6, %v641_v14, %v633_v13  ;;  %v954_v24 = vsel %vm952_vm9, %v641_v14, %v633_v13 }
 0x122   : > { %v996_v12 = vadd.f32 %v994_v28, %v992_v15  ;;  %v1017_v59 = vadd.f32 %v1015_v63, %v1013_v53 }
 0x123   : > { %v639_v34 = vsel %vm637_vm5, %v625_v36, %v638_v16  ;;  %v951_v20 = vsel %vm949_vm8, %v625_v36, %v638_v16 }
 0x124   : > { %998 = vst [vmem:[%s304_s13] sm:$0xff] %v996_v12  ;;  %v643_v9 = vsel %vm636_vm4, %v639_v34, %v642_v30  ;;  %v955_v43 = vsel %vm948_vm7, %v951_v20, %v954_v24 }
 0x125   : > { %1216 = vst [vmem:[%s304_s13 + $0x10] sm:$0xff] %v1017_v59  ;;  %v644_v45 = vsel %vm634_vm10, nan, %v643_v9  ;;  %v956_v10 = vsel %vm634_vm10, nan, %v955_v43 }
 0x126   : > { %v993_v46 = vmul.f32 %v1582_v4, %v644_v45  ;;  %v995_v22 = vmul.f32 %v991_v23, %v956_v10  ;;  %v1014_v47 = vmul.f32 %v1589_v8, %v644_v45  ;;  %v1016_v48 = vmul.f32 %v1012_v0, %v956_v10 }
 0x128   : > { %v997_v49 = vadd.f32 %v995_v22, %v993_v46  ;;  %v1018_v50 = vadd.f32 %v1016_v48, %v1014_v47 }
 0x12a   : > { %999 = vst [vmem:[%s304_s13 + $0x8] sm:$0xff] %v997_v49 }
 0x12b   : > { %1217 = vst [vmem:[%s304_s13 + $0x18] sm:$0xff] %v1018_v50 }
 0x12c   : > { %s1224_s24 = sshll.u32 %s1395_s18, 4  ;;  %s1050_s7 = sshll.u32 %s304_s13, 4  ;;  %s1051_s7 = int_to_ptr.vmem [resolvable:$true] %s1050_s7 }
 0x12d   : > { %s1039_s27 = scalar_lea.hbm %s1854_s4, %s1224_s24  ;;  %s1421_s6 = smov 256  }
 0x12e   : > { %s1052_s26 = sshll.u32 %s1039_s27, 4  ;;  %1238 = sst [smem:[#allocation13]] (%p1510_p9), %s1421_s6  ;;  %s1053_s26 = int_to_ptr.hbm [resolvable:$true] %s1052_s26 }
 0x12f   : > { %s1422_s0 = smov 1024   ;;  %s1423_s8 = smov 2  }
 0x130   : > { %1239 = sst [smem:[#allocation13 + $0x1]] (%p1510_p9), %s1422_s0  ;;  %s1424_s18 = smov 128  }
 0x131   : > { %1240 = sst [smem:[#allocation13 + $0x2]] (%p1510_p9), %s1423_s8  ;;  %s1425_s9 = smov 8  }
 0x132   : > { %1241 = sst [smem:[#allocation13 + $0x3]] (%p1510_p9), %s1424_s18  ;;  %s1426_s10 = smov [#allocation12]  }
 0x133   : > { %1242 = sst [smem:[#allocation13 + $0x4]] (%p1510_p9), %s1424_s18  ;;  %s1427_s28 = smov 0  }
 0x134   : > { %1243 = sst [smem:[#allocation13 + $0x5]] (%p1510_p9), %s1425_s9 }
 0x135   : > { %1244 = dma.general (%p1510_p9), %s1051_s7, 512, %s1053_s26, %s1023_s22, %s1426_s10, [#allocation13], %s1427_s28, 0  }
 0x136 PF: > { %p1256_p4 = scmp.ge.s32.totalorder %s1403_s20, 2  ;;  %s1080_s14 = sand.u32 1, %s1383_s15  }
 0x137   : > { %s1081_s12 = scalar_lea.sflag [#allocation6], %s1080_s14 }
 0x138   : > { %p1251_p5 = pnand %p1256_p4, %p1517_p11 }
 0x13a   : > { %p1252_p6 = pneg %p1251_p5 }
 0x13c   : > { %1378 = dma.done.wait (%p1252_p6), %s1081_s12, 512  }
 0x13d   : > { %1380 = vsyncadd (%p1252_p6), %s1081_s12, 4294966784  ;;  %s21_s20 = sadd.s32 1, %s1403_s20   ;;  %s1867_s15 = smov %s1387_s16 }
 0x13e   : > { %p18_p7 = scmp.ge.s32.totalorder %s21_s20, 6   ;;  %s1868_s16 = smov %s1391_s17 }
 0x13f   : > { %s1869_s17 = smov %s1515_s30  ;;  %s1870_s18 = smov %s1399_s19 }
 0x140   : > { %s1871_s19 = smov %s1873_s23  ;;  %20 = sbr.rel (!%p18_p7) target bundleno = 9 (0x9), region = 101 }
 0x145   :  { %1087 = vsyncpa [#allocation5], 1 }
 0x146   :  { %1089 = vsyncpa [#allocation5 + $0x1], 1 }
 0x147   :  { %1090 = vsyncpa [#allocation6], 1 }
 0x148   :  { %1092 = vsyncpa [#allocation6 + $0x1], 1 }
 0x149   :  { %1093 = vsyncpa [#allocation7], 1 }
 0x14a   :  { %1095 = vsyncpa [#allocation7 + $0x1], 1 }

</bundles_post_ra>
